<compile_context>
chip_gen: v7x
topology: tpu7x:2x2x1
jax: 0.10.0
libtpu: 0.0.40
codegen_flags: <defaults>
</compile_context>

<pallas_src>
import functools
import math

import jax
import jax.numpy as jnp
from jax.experimental import pallas as pl
from jax.experimental.pallas import tpu as pltpu

# ------------------------- problem sizes (small) ---------------------------
B = 2          # batch
T = 8          # sequence length (n_ctx)
D = 32         # n_state
H = 4          # n_head
DH = D // H    # head dim
D_MLP = 4 * D  # mlp hidden
LN_EPS = 1e-5  # torch.nn.LayerNorm default
NEG_INF = -1e30  # large finite negative -> no inf/NaN risk in softmax


def _layernorm(x, gamma, beta):
    # matches torch LayerNorm (biased variance), computed in float32
    mu = jnp.mean(x, axis=-1, keepdims=True)
    var = jnp.mean((x - mu) * (x - mu), axis=-1, keepdims=True)
    return (x - mu) * jax.lax.rsqrt(var + LN_EPS) * gamma + beta


def _softmax_last(x):
    m = jnp.max(x, axis=-1, keepdims=True)
    e = jnp.exp(x - m)
    s = jnp.sum(e, axis=-1, keepdims=True)
    r = pl.reciprocal(s, approx=True)      # EUP slot (nearly free)
    r = r * (2.0 - s * r)                  # one Newton-Raphson step -> f32-exact
    return e * r


def _gelu_exact(x):
    # torch nn.GELU() default = exact erf formulation
    return 0.5 * x * (1.0 + jax.lax.erf(x * (1.0 / math.sqrt(2.0))))


def _block_kernel(n_head, d_head, n_state, d_mlp, causal,
                  x_ref, vec_ref, wqkv_ref, wo_ref, w1_ref, w2_ref, o_ref):
    """One grid step processes one batch element (T rows).

    x_ref   : (T, D)
    vec_ref : (8, 128)       packed per-channel params (see wrapper)
    wqkv_ref: (D, 3D)        fused QKV weight (scale folded into Q/K parts)
    wo_ref  : (H, DH, D)     output projection, head-major
    w1_ref  : (D, D_MLP)     W1^T
    w2_ref  : (D_MLP, D)     W2^T
    """
    nh, dh, d = n_head, d_head, n_state
    x = x_ref[...].astype(jnp.float32)                    # (T, D)
    t = x.shape[0]

    ln1_g = vec_ref[0:1, :d]
    ln1_b = vec_ref[1:2, :d]
    bqkv  = vec_ref[2:3, :3 * d]                          # (1, 3D)
    bo    = vec_ref[3:4, :d]
    ln2_g = vec_ref[4:5, :d]
    ln2_b = vec_ref[5:6, :d]
    b1    = vec_ref[6:7, :d_mlp]                          # (1, D_MLP)
    b2    = vec_ref[7:8, :d]

    # ---- self-attention branch -------------------------------------------
    h = _layernorm(x, ln1_g, ln1_b)                       # attn_ln (float32)

    # Fused QKV projection (scale already folded into Wq/bq/Wk in the wrapper).
    qkv = jnp.dot(h, wqkv_ref[...],
                  preferred_element_type=jnp.float32) + bqkv         # (T, 3D)

    # Head-major layout (3H, T, DH): 2-D transpose -> free major-split view ->
    # batched minor transpose.  (Output-side relayout chain removed below.)
    qkv_h = jnp.transpose(qkv.T.reshape(3 * nh, dh, t), (0, 2, 1))    # (3H, T, DH)
    qh = qkv_h[0:nh]                                      # (H, T, DH)
    kh = qkv_h[nh:2 * nh]
    vh = qkv_h[2 * nh:3 * nh]

    # Batched attention over heads.
    s = jnp.einsum('hqd,hkd->hqk', qh, kh,
                   preferred_element_type=jnp.float32)    # (H, T, T)

    if causal:
        # Causal additive bias generated in-kernel -> no (T, T) mask DMA.
        row = jax.lax.broadcasted_iota(jnp.int32, (t, t), 0)
        col = jax.lax.broadcasted_iota(jnp.int32, (t, t), 1)
        bias = jnp.where(col > row, jnp.float32(NEG_INF), jnp.float32(0.0))
        s = s + bias[None, :, :]

    w = _softmax_last(s)                                  # (H, T, T)
    o = jnp.einsum('hqk,hkd->hqd', w, vh,
                   preferred_element_type=jnp.float32)    # (H, T, DH)

    # Output projection applied per head and reduced over heads: avoids the
    # (H, T, DH) -> (T, D) transpose/reshape relayouts entirely.
    attn = jnp.sum(
        jnp.einsum('hqd,hde->hqe', o, wo_ref[...],
                   preferred_element_type=jnp.float32), axis=0) + bo  # (T, D)
    x = x + attn                                          # residual 1

    # ---- MLP branch ---------------------------------------------------------
    h2 = _layernorm(x, ln2_g, ln2_b)                      # mlp_ln
    hidden = jnp.dot(h2, w1_ref[...],
                     preferred_element_type=jnp.float32) + b1         # (T, D_MLP)
    hidden = _gelu_exact(hidden)
    mlp = jnp.dot(hidden, w2_ref[...],
                  preferred_element_type=jnp.float32) + b2
    x = x + mlp                                           # residual 2

    # Output last dim is D=32 (<128) at this toy size -> masked stores; at real
    # Whisper sizes D is a multiple of 128 and stores are unmasked.
    o_ref[...] = x.astype(o_ref.dtype)


def residual_attention_block(x, params, *, causal=True):
    """x: (B, T, D) float32.  Causal mask is generated in-kernel.

    Grid is (B,) marked "parallel": one batch element per step; on v7x the two
    steps shard across the two TensorCores.
    """
    bsz, seq, d = x.shape
    (ln1_g, ln1_b, wq, bq, wk, wv, bv, wo, bo,
     ln2_g, ln2_b, w1, b1, w2, b2) = params
    d_mlp = w1.shape[1]
    n_head = H
    d_head = d // n_head

    # Fold d_head^-0.25 attention scale into the Q/K projections.
    scale = d_head ** (-0.25)
    wqkv = jnp.concatenate([wq * scale, wk * scale, wv], axis=1)       # (D, 3D)
    bqkv = jnp.concatenate([bq.reshape(-1) * scale,
                            jnp.zeros((d,), jnp.float32),              # K: no bias
                            bv.reshape(-1)])                           # (3D,)

    # Output projection reshaped head-major in the wrapper (free at trace time).
    wo_heads = wo.reshape(n_head, d_head, d)                           # (H, DH, D)

    # Packed per-channel parameters: one lane-dense (8, 128) block.
    wpad = 128 * pl.cdiv(max(3 * d, d_mlp, d), 128)
    vecs = jnp.zeros((8, wpad), jnp.float32)
    vecs = vecs.at[0, :d].set(ln1_g.reshape(-1))
    vecs = vecs.at[1, :d].set(ln1_b.reshape(-1))
    vecs = vecs.at[2, :3 * d].set(bqkv)
    vecs = vecs.at[3, :d].set(bo.reshape(-1))
    vecs = vecs.at[4, :d].set(ln2_g.reshape(-1))
    vecs = vecs.at[5, :d].set(ln2_b.reshape(-1))
    vecs = vecs.at[6, :d_mlp].set(b1.reshape(-1))
    vecs = vecs.at[7, :d].set(b2.reshape(-1))

    x2 = x.reshape(bsz * seq, d)

    kernel = functools.partial(_block_kernel, n_head, d_head, d, d_mlp, causal)

    out2 = pl.pallas_call(
        kernel,
        out_shape=jax.ShapeDtypeStruct((bsz * seq, d), x.dtype),
        grid_spec=pltpu.PrefetchScalarGridSpec(
            num_scalar_prefetch=0,
            grid=(bsz,),
            in_specs=[
                pl.BlockSpec((seq, d), lambda b: (b, 0)),              # x rows
                pl.BlockSpec((8, wpad), lambda b: (0, 0)),             # packed vecs
                pl.BlockSpec((d, 3 * d), lambda b: (0, 0)),            # Wqkv
                pl.BlockSpec((n_head, d_head, d), lambda b: (0, 0, 0)),  # Wo heads
                pl.BlockSpec((d, d_mlp), lambda b: (0, 0)),            # W1^T
                pl.BlockSpec((d_mlp, d), lambda b: (0, 0)),            # W2^T
            ],
            out_specs=pl.BlockSpec((seq, d), lambda b: (b, 0)),
        ),
        compiler_params=pltpu.CompilerParams(
            dimension_semantics=("parallel",)),
    )(x2, vecs, wqkv, wo_heads, w1, w2)

    return out2.reshape(bsz, seq, d)


# ----------------------------- pure-JAX reference ---------------------------
def reference(x, mask, params):
    (ln1_g, ln1_b, wq, bq, wk, wv, bv, wo, bo,
     ln2_g, ln2_b, w1, b1, w2, b2) = params
    ln1_g, ln1_b = ln1_g[0], ln1_b[0]
    ln2_g, ln2_b = ln2_g[0], ln2_b[0]

    def ln(v, g, b):
        mu = jnp.mean(v, axis=-1, keepdims=True)
        var = jnp.mean((v - mu) ** 2, axis=-1, keepdims=True)
        return (v - mu) / jnp.sqrt(var + LN_EPS) * g + b

    h = ln(x, ln1_g, ln1_b)
    q = h @ wq + bq[0]
    k = h @ wk
    v = h @ wv + bv[0]
    scale = DH ** (-0.25)
    qh = q.reshape(B, T, H, DH).transpose(0, 2, 1, 3) * scale
    kh = k.reshape(B, T, H, DH).transpose(0, 2, 3, 1) * scale
    vh = v.reshape(B, T, H, DH).transpose(0, 2, 1, 3)
    qk = qh @ kh + mask[:T, :T]
    w = jax.nn.softmax(qk, axis=-1)
    wv_ = (w @ vh).transpose(0, 2, 1, 3).reshape(B, T, D)
    x = x + (wv_ @ wo + bo[0])

    h2 = ln(x, ln2_g, ln2_b)
    m = h2 @ w1 + b1[0]
    m = 0.5 * m * (1.0 + jax.lax.erf(m / jnp.sqrt(2.0)))
    m = m @ w2 + b2[0]
    return x + m


# --------------------------------- main --------------------------------------
if __name__ == "__main__":
    key = jax.random.PRNGKey(0)
    ks = jax.random.split(key, 16)

    def rnd(k, shape, scale=0.05):
        return (scale * jax.random.normal(k, shape)).astype(jnp.float32)

    x = rnd(ks[0], (B, T, D), scale=1.0)

    # Whisper-style causal additive mask (reference only; kernel generates it
    # in-kernel from iota).
    mask = jnp.triu(jnp.full((T, T), -jnp.inf, dtype=jnp.float32), k=1)

    # Parameters (Linear weights stored pre-transposed as (in, out)).
    params = (
        (1.0 + rnd(ks[1], (1, D))),          # ln1 gamma
        rnd(ks[2], (1, D)),                  # ln1 beta
        rnd(ks[3], (D, D)),                  # Wq^T
        rnd(ks[4], (1, D)),                  # bq
        rnd(ks[5], (D, D)),                  # Wk^T (no bias)
        rnd(ks[6], (D, D)),                  # Wv^T
        rnd(ks[7], (1, D)),                  # bv
        rnd(ks[8], (D, D)),                  # Wo^T
        rnd(ks[9], (1, D)),                  # bo
        (1.0 + rnd(ks[10], (1, D))),         # ln2 gamma
        rnd(ks[11], (1, D)),                 # ln2 beta
        rnd(ks[12], (D, D_MLP)),             # W1^T
        rnd(ks[13], (1, D_MLP)),             # b1
        rnd(ks[14], (D_MLP, D)),             # W2^T
        rnd(ks[15], (1, D)),                 # b2
    )

    ref = jax.block_until_ready(reference(x, mask, params))

    out = jax.block_until_ready(residual_attention_block(x, params, causal=True))
    assert out.shape == (B, T, D) and out.dtype == jnp.float32
    # Newton-refined approx reciprocal + folded-scale rounding -> ~1e-6 error.
    assert jnp.allclose(out, ref, atol=1e-4, rtol=1e-4), (
        f"max err {jnp.max(jnp.abs(out - ref))}")

    # TODO(synk): kv_cache / cross-attention paths are not modeled (module
    # defaults cross_attention=False, kv_cache=None); an arbitrary user mask
    # (non-causal) would require an extra (T, T) input instead of in-kernel iota.
    print("KERNEL_OK")
</pallas_src>

<mosaic_0001>
module attributes {stable_mosaic.version = 11 : i64} {
  func.func @_block_kernel(%arg0: i32, %arg1: memref<8x32xf32, #tpu.memory_space<vmem>>, %arg2: memref<8x128xf32, #tpu.memory_space<vmem>>, %arg3: memref<32x96xf32, #tpu.memory_space<vmem>>, %arg4: memref<4x8x32xf32, #tpu.memory_space<vmem>>, %arg5: memref<32x128xf32, #tpu.memory_space<vmem>>, %arg6: memref<128x32xf32, #tpu.memory_space<vmem>>, %arg7: memref<8x32xf32, #tpu.memory_space<vmem>>) attributes {dimension_semantics = [#tpu.dimension_semantics<parallel>], iteration_bounds = array<i64: 2>, scalar_prefetch = 0 : i64, scratch_operands = 0 : i64, tpu.core_type = #tpu.core_type<tc>, window_params = [{transform_indices = @transform_0, window_bounds = array<i64: 8, 32>}, {pipeline_mode = #tpu.pipeline_mode<synchronous>, transform_indices = @transform_1, window_bounds = array<i64: 8, 128>}, {pipeline_mode = #tpu.pipeline_mode<synchronous>, transform_indices = @transform_2, window_bounds = array<i64: 32, 96>}, {pipeline_mode = #tpu.pipeline_mode<synchronous>, transform_indices = @transform_3, window_bounds = array<i64: 4, 8, 32>}, {pipeline_mode = #tpu.pipeline_mode<synchronous>, transform_indices = @transform_4, window_bounds = array<i64: 32, 128>}, {pipeline_mode = #tpu.pipeline_mode<synchronous>, transform_indices = @transform_5, window_bounds = array<i64: 128, 32>}, {transform_indices = @transform_6, window_bounds = array<i64: 8, 32>}]} {
    %c0 = arith.constant 0 : index
    %c0_0 = arith.constant 0 : index
    %0 = vector.load %arg1[%c0, %c0_0] : memref<8x32xf32, #tpu.memory_space<vmem>>, vector<8x32xf32>
    %c0_1 = arith.constant 0 : index
    %c0_2 = arith.constant 0 : index
    %1 = vector.load %arg2[%c0_1, %c0_2] : memref<8x128xf32, #tpu.memory_space<vmem>>, vector<1x32xf32>
    %c1 = arith.constant 1 : index
    %c0_3 = arith.constant 0 : index
    %2 = vector.load %arg2[%c1, %c0_3] : memref<8x128xf32, #tpu.memory_space<vmem>>, vector<1x32xf32>
    %c2 = arith.constant 2 : index
    %c0_4 = arith.constant 0 : index
    %3 = vector.load %arg2[%c2, %c0_4] : memref<8x128xf32, #tpu.memory_space<vmem>>, vector<1x96xf32>
    %c3 = arith.constant 3 : index
    %c0_5 = arith.constant 0 : index
    %4 = vector.load %arg2[%c3, %c0_5] : memref<8x128xf32, #tpu.memory_space<vmem>>, vector<1x32xf32>
    %c4 = arith.constant 4 : index
    %c0_6 = arith.constant 0 : index
    %5 = vector.load %arg2[%c4, %c0_6] : memref<8x128xf32, #tpu.memory_space<vmem>>, vector<1x32xf32>
    %c5 = arith.constant 5 : index
    %c0_7 = arith.constant 0 : index
    %6 = vector.load %arg2[%c5, %c0_7] : memref<8x128xf32, #tpu.memory_space<vmem>>, vector<1x32xf32>
    %c6 = arith.constant 6 : index
    %c0_8 = arith.constant 0 : index
    %7 = vector.load %arg2[%c6, %c0_8] : memref<8x128xf32, #tpu.memory_space<vmem>>, vector<1x128xf32>
    %c7 = arith.constant 7 : index
    %c0_9 = arith.constant 0 : index
    %8 = vector.load %arg2[%c7, %c0_9] : memref<8x128xf32, #tpu.memory_space<vmem>>, vector<1x32xf32>
    %cst = arith.constant dense<0.000000e+00> : vector<8xf32>
    %9 = vector.multi_reduction <add>, %0, %cst [1] : vector<8x32xf32> to vector<8xf32>
    %10 = vector.shape_cast %9 : vector<8xf32> to vector<8x1xf32>
    %cst_10 = arith.constant 3.200000e+01 : f32
    %11 = vector.broadcast %cst_10 : f32 to vector<8x1xf32>
    %12 = arith.divf %10, %11 : vector<8x1xf32>
    %13 = vector.broadcast %12 : vector<8x1xf32> to vector<8x32xf32>
    %14 = arith.subf %0, %13 : vector<8x32xf32>
    %15 = vector.broadcast %12 : vector<8x1xf32> to vector<8x32xf32>
    %16 = arith.subf %0, %15 : vector<8x32xf32>
    %17 = arith.mulf %14, %16 : vector<8x32xf32>
    %cst_11 = arith.constant dense<0.000000e+00> : vector<8xf32>
    %18 = vector.multi_reduction <add>, %17, %cst_11 [1] : vector<8x32xf32> to vector<8xf32>
    %19 = vector.shape_cast %18 : vector<8xf32> to vector<8x1xf32>
    %cst_12 = arith.constant 3.200000e+01 : f32
    %20 = vector.broadcast %cst_12 : f32 to vector<8x1xf32>
    %21 = arith.divf %19, %20 : vector<8x1xf32>
    %22 = vector.broadcast %12 : vector<8x1xf32> to vector<8x32xf32>
    %23 = arith.subf %0, %22 : vector<8x32xf32>
    %cst_13 = arith.constant 9.99999974E-6 : f32
    %24 = vector.broadcast %cst_13 : f32 to vector<8x1xf32>
    %25 = arith.addf %21, %24 : vector<8x1xf32>
    %26 = math.rsqrt %25 : vector<8x1xf32>
    %27 = vector.broadcast %26 : vector<8x1xf32> to vector<8x32xf32>
    %28 = arith.mulf %23, %27 : vector<8x32xf32>
    %29 = vector.broadcast %1 : vector<1x32xf32> to vector<8x32xf32>
    %30 = arith.mulf %28, %29 : vector<8x32xf32>
    %31 = vector.broadcast %2 : vector<1x32xf32> to vector<8x32xf32>
    %32 = arith.addf %30, %31 : vector<8x32xf32>
    %c0_14 = arith.constant 0 : index
    %c0_15 = arith.constant 0 : index
    %33 = vector.load %arg3[%c0_14, %c0_15] : memref<32x96xf32, #tpu.memory_space<vmem>>, vector<32x96xf32>
    %cst_16 = arith.constant dense<0.000000e+00> : vector<8x96xf32>
    %34 = tpu.matmul %32, %33, %cst_16 {dimension_numbers = #tpu.dot_dimension_numbers<[1], [0], [0], [1], [0, 0, 1, 1], [], []>} : vector<8x32xf32>, vector<32x96xf32>, vector<8x96xf32> -> vector<8x96xf32>
    %35 = vector.broadcast %3 : vector<1x96xf32> to vector<8x96xf32>
    %36 = arith.addf %34, %35 : vector<8x96xf32>
    %37 = tpu.transpose %36, [1, 0] : vector<8x96xf32> -> vector<96x8xf32>
    %38 = vector.shape_cast %37 : vector<96x8xf32> to vector<12x8x8xf32>
    %39 = tpu.transpose %38, [0, 2, 1] : vector<12x8x8xf32> -> vector<12x8x8xf32>
    %40 = vector.extract_strided_slice %39 {offsets = [0, 0, 0], sizes = [4, 8, 8], strides = [1, 1, 1]} : vector<12x8x8xf32> to vector<4x8x8xf32>
    %41 = vector.extract_strided_slice %39 {offsets = [4, 0, 0], sizes = [4, 8, 8], strides = [1, 1, 1]} : vector<12x8x8xf32> to vector<4x8x8xf32>
    %42 = vector.extract_strided_slice %39 {offsets = [8, 0, 0], sizes = [4, 8, 8], strides = [1, 1, 1]} : vector<12x8x8xf32> to vector<4x8x8xf32>
    "tpu.trace_start"() <{level = 10 : i32, message = "hqd,hkd->hqk"}> : () -> ()
    %cst_17 = arith.constant dense<0.000000e+00> : vector<4x8x8xf32>
    %43 = tpu.matmul %40, %41, %cst_17 {dimension_numbers = #tpu.dot_dimension_numbers<[2], [2], [1], [1], [0, 0, 0, 1, 1, 1], [0], [0]>} : vector<4x8x8xf32>, vector<4x8x8xf32>, vector<4x8x8xf32> -> vector<4x8x8xf32>
    "tpu.trace_stop"() : () -> ()
    %44 = tpu.iota {dimensions = array<i32: 0>} : vector<8x8xi32>
    %45 = tpu.iota {dimensions = array<i32: 1>} : vector<8x8xi32>
    %46 = arith.cmpi sgt, %45, %44 : vector<8x8xi32>
    %cst_18 = arith.constant -1.000000e+30 : f32
    %cst_19 = arith.constant 0.000000e+00 : f32
    %47 = vector.broadcast %cst_18 : f32 to vector<8x8xf32>
    %48 = vector.broadcast %cst_19 : f32 to vector<8x8xf32>
    %49 = arith.select %46, %47, %48 : vector<8x8xi1>, vector<8x8xf32>
    %50 = vector.shape_cast %49 : vector<8x8xf32> to vector<1x8x8xf32>
    %51 = vector.broadcast %50 : vector<1x8x8xf32> to vector<4x8x8xf32>
    %52 = arith.addf %43, %51 : vector<4x8x8xf32>
    %cst_20 = arith.constant dense<0xFF800000> : vector<4x8xf32>
    %53 = vector.multi_reduction <maximumf>, %52, %cst_20 [2] : vector<4x8x8xf32> to vector<4x8xf32>
    %54 = vector.shape_cast %53 : vector<4x8xf32> to vector<4x8x1xf32>
    %55 = vector.broadcast %54 : vector<4x8x1xf32> to vector<4x8x8xf32>
    %56 = arith.subf %52, %55 : vector<4x8x8xf32>
    %57 = math.exp %56 : vector<4x8x8xf32>
    %cst_21 = arith.constant dense<0.000000e+00> : vector<4x8xf32>
    %58 = vector.multi_reduction <add>, %57, %cst_21 [2] : vector<4x8x8xf32> to vector<4x8xf32>
    %59 = vector.shape_cast %58 : vector<4x8xf32> to vector<4x8x1xf32>
    %60 = tpu.reciprocal %59 {approx = true} : vector<4x8x1xf32> -> vector<4x8x1xf32>
    %61 = arith.mulf %59, %60 : vector<4x8x1xf32>
    %cst_22 = arith.constant 2.000000e+00 : f32
    %62 = vector.broadcast %cst_22 : f32 to vector<4x8x1xf32>
    %63 = arith.subf %62, %61 : vector<4x8x1xf32>
    %64 = arith.mulf %60, %63 : vector<4x8x1xf32>
    %65 = vector.broadcast %64 : vector<4x8x1xf32> to vector<4x8x8xf32>
    %66 = arith.mulf %57, %65 : vector<4x8x8xf32>
    "tpu.trace_start"() <{level = 10 : i32, message = "hqk,hkd->hqd"}> : () -> ()
    %cst_23 = arith.constant dense<0.000000e+00> : vector<4x8x8xf32>
    %67 = tpu.matmul %66, %42, %cst_23 {dimension_numbers = #tpu.dot_dimension_numbers<[2], [1], [1], [2], [0, 0, 0, 1, 1, 2], [0], [0]>} : vector<4x8x8xf32>, vector<4x8x8xf32>, vector<4x8x8xf32> -> vector<4x8x8xf32>
    "tpu.trace_stop"() : () -> ()
    %c0_24 = arith.constant 0 : index
    %c0_25 = arith.constant 0 : index
    %c0_26 = arith.constant 0 : index
    %68 = vector.load %arg4[%c0_24, %c0_25, %c0_26] : memref<4x8x32xf32, #tpu.memory_space<vmem>>, vector<4x8x32xf32>
    "tpu.trace_start"() <{level = 10 : i32, message = "hqd,hde->hqe"}> : () -> ()
    %cst_27 = arith.constant dense<0.000000e+00> : vector<4x8x32xf32>
    %69 = tpu.matmul %67, %68, %cst_27 {dimension_numbers = #tpu.dot_dimension_numbers<[2], [1], [1], [2], [0, 0, 0, 1, 1, 2], [0], [0]>} : vector<4x8x8xf32>, vector<4x8x32xf32>, vector<4x8x32xf32> -> vector<4x8x32xf32>
    "tpu.trace_stop"() : () -> ()
    %cst_28 = arith.constant dense<0.000000e+00> : vector<8x32xf32>
    %70 = vector.multi_reduction <add>, %69, %cst_28 [0] : vector<4x8x32xf32> to vector<8x32xf32>
    %71 = vector.broadcast %4 : vector<1x32xf32> to vector<8x32xf32>
    %72 = arith.addf %70, %71 : vector<8x32xf32>
    %73 = arith.addf %0, %72 : vector<8x32xf32>
    %cst_29 = arith.constant dense<0.000000e+00> : vector<8xf32>
    %74 = vector.multi_reduction <add>, %73, %cst_29 [1] : vector<8x32xf32> to vector<8xf32>
    %75 = vector.shape_cast %74 : vector<8xf32> to vector<8x1xf32>
    %cst_30 = arith.constant 3.200000e+01 : f32
    %76 = vector.broadcast %cst_30 : f32 to vector<8x1xf32>
    %77 = arith.divf %75, %76 : vector<8x1xf32>
    %78 = vector.broadcast %77 : vector<8x1xf32> to vector<8x32xf32>
    %79 = arith.subf %73, %78 : vector<8x32xf32>
    %80 = vector.broadcast %77 : vector<8x1xf32> to vector<8x32xf32>
    %81 = arith.subf %73, %80 : vector<8x32xf32>
    %82 = arith.mulf %79, %81 : vector<8x32xf32>
    %cst_31 = arith.constant dense<0.000000e+00> : vector<8xf32>
    %83 = vector.multi_reduction <add>, %82, %cst_31 [1] : vector<8x32xf32> to vector<8xf32>
    %84 = vector.shape_cast %83 : vector<8xf32> to vector<8x1xf32>
    %cst_32 = arith.constant 3.200000e+01 : f32
    %85 = vector.broadcast %cst_32 : f32 to vector<8x1xf32>
    %86 = arith.divf %84, %85 : vector<8x1xf32>
    %87 = vector.broadcast %77 : vector<8x1xf32> to vector<8x32xf32>
    %88 = arith.subf %73, %87 : vector<8x32xf32>
    %cst_33 = arith.constant 9.99999974E-6 : f32
    %89 = vector.broadcast %cst_33 : f32 to vector<8x1xf32>
    %90 = arith.addf %86, %89 : vector<8x1xf32>
    %91 = math.rsqrt %90 : vector<8x1xf32>
    %92 = vector.broadcast %91 : vector<8x1xf32> to vector<8x32xf32>
    %93 = arith.mulf %88, %92 : vector<8x32xf32>
    %94 = vector.broadcast %5 : vector<1x32xf32> to vector<8x32xf32>
    %95 = arith.mulf %93, %94 : vector<8x32xf32>
    %96 = vector.broadcast %6 : vector<1x32xf32> to vector<8x32xf32>
    %97 = arith.addf %95, %96 : vector<8x32xf32>
    %c0_34 = arith.constant 0 : index
    %c0_35 = arith.constant 0 : index
    %98 = vector.load %arg5[%c0_34, %c0_35] : memref<32x128xf32, #tpu.memory_space<vmem>>, vector<32x128xf32>
    %cst_36 = arith.constant dense<0.000000e+00> : vector<8x128xf32>
    %99 = tpu.matmul %97, %98, %cst_36 {dimension_numbers = #tpu.dot_dimension_numbers<[1], [0], [0], [1], [0, 0, 1, 1], [], []>} : vector<8x32xf32>, vector<32x128xf32>, vector<8x128xf32> -> vector<8x128xf32>
    %100 = vector.broadcast %7 : vector<1x128xf32> to vector<8x128xf32>
    %101 = arith.addf %99, %100 : vector<8x128xf32>
    %cst_37 = arith.constant 5.000000e-01 : f32
    %102 = vector.broadcast %cst_37 : f32 to vector<8x128xf32>
    %103 = arith.mulf %102, %101 : vector<8x128xf32>
    %cst_38 = arith.constant 0.707106769 : f32
    %104 = vector.broadcast %cst_38 : f32 to vector<8x128xf32>
    %105 = arith.mulf %101, %104 : vector<8x128xf32>
    %106 = math.erf %105 : vector<8x128xf32>
    %cst_39 = arith.constant 1.000000e+00 : f32
    %107 = vector.broadcast %cst_39 : f32 to vector<8x128xf32>
    %108 = arith.addf %107, %106 : vector<8x128xf32>
    %109 = arith.mulf %103, %108 : vector<8x128xf32>
    %c0_40 = arith.constant 0 : index
    %c0_41 = arith.constant 0 : index
    %110 = vector.load %arg6[%c0_40, %c0_41] : memref<128x32xf32, #tpu.memory_space<vmem>>, vector<128x32xf32>
    %cst_42 = arith.constant dense<0.000000e+00> : vector<8x32xf32>
    %111 = tpu.matmul %109, %110, %cst_42 {dimension_numbers = #tpu.dot_dimension_numbers<[1], [0], [0], [1], [0, 0, 1, 1], [], []>} : vector<8x128xf32>, vector<128x32xf32>, vector<8x32xf32> -> vector<8x32xf32>
    %112 = vector.broadcast %8 : vector<1x32xf32> to vector<8x32xf32>
    %113 = arith.addf %111, %112 : vector<8x32xf32>
    %114 = arith.addf %73, %113 : vector<8x32xf32>
    %c0_43 = arith.constant 0 : index
    %c0_44 = arith.constant 0 : index
    %115 = vector.load %arg7[%c0_43, %c0_44] : memref<8x32xf32, #tpu.memory_space<vmem>>, vector<8x32xf32>
    tpu.vector_store %arg7[%c0_43, %c0_44], %114 {strides = array<i32>} : memref<8x32xf32, #tpu.memory_space<vmem>>, vector<8x32xf32>,
    return
  }
  func.func @transform_0(%arg0: i32) -> (i32, i32) {
    %c0_i32 = arith.constant 0 : i32
    %c0_i32_0 = arith.constant 0 : i32
    return %arg0, %c0_i32 : i32, i32
  }
  func.func @transform_1(%arg0: i32) -> (i32, i32) {
    %c0_i32 = arith.constant 0 : i32
    %c0_i32_0 = arith.constant 0 : i32
    %c0_i32_1 = arith.constant 0 : i32
    return %c0_i32, %c0_i32_0 : i32, i32
  }
  func.func @transform_2(%arg0: i32) -> (i32, i32) {
    %c0_i32 = arith.constant 0 : i32
    %c0_i32_0 = arith.constant 0 : i32
    %c0_i32_1 = arith.constant 0 : i32
    return %c0_i32, %c0_i32_0 : i32, i32
  }
  func.func @transform_3(%arg0: i32) -> (i32, i32, i32) {
    %c0_i32 = arith.constant 0 : i32
    %c0_i32_0 = arith.constant 0 : i32
    %c0_i32_1 = arith.constant 0 : i32
    %c0_i32_2 = arith.constant 0 : i32
    return %c0_i32, %c0_i32_0, %c0_i32_1 : i32, i32, i32
  }
  func.func @transform_4(%arg0: i32) -> (i32, i32) {
    %c0_i32 = arith.constant 0 : i32
    %c0_i32_0 = arith.constant 0 : i32
    %c0_i32_1 = arith.constant 0 : i32
    return %c0_i32, %c0_i32_0 : i32, i32
  }
  func.func @transform_5(%arg0: i32) -> (i32, i32) {
    %c0_i32 = arith.constant 0 : i32
    %c0_i32_0 = arith.constant 0 : i32
    %c0_i32_1 = arith.constant 0 : i32
    return %c0_i32, %c0_i32_0 : i32, i32
  }
  func.func @transform_6(%arg0: i32) -> (i32, i32) {
    %c0_i32 = arith.constant 0 : i32
    %c0_i32_0 = arith.constant 0 : i32
    return %arg0, %c0_i32 : i32, i32
  }
}

</mosaic_0001>

<bundles_post_ra>
// kernel: tpu_custom_call.1
= control target key start
LH: loop header
LB: loop body
LE: loop exit
PB: predicated region body
PF: predicated region fallthrough
CT: control target
= control target key end

     0   :  { %11 = vsyncpa [#allocation3], 0  ;;  %s2747_s0 = inlined_call_operand.vmem [shape: f32[16,32], index: 0, kind: input, shape index: {}]   ;;  %s2748_s1 = inlined_call_operand.vmem [shape: f32[8,128], index: 1, kind: input, shape index: {}]   ;;  %s2749_s2 = inlined_call_operand.vmem [shape: f32[32,96], index: 2, kind: input, shape index: {}]   ;;  %s2750_s3 = inlined_call_operand.vmem [shape: f32[4,8,32], index: 3, kind: input, shape index: {}]   ;;  %s2751_s4 = inlined_call_operand.vmem [shape: f32[32,128], index: 4, kind: input, shape index: {}]   ;;  %s2752_s5 = inlined_call_operand.vmem [shape: f32[128,32], index: 5, kind: input, shape index: {}]   ;;  %s2753_s6 = inlined_call_operand.hbm [shape: f32[16,32], index: 6, kind: output, shape index: {}]  }
   0x1   :  { %13 = vsyncpa [#allocation3 + $0x1], 0  ;;  %s2427_s21 = smov 0   ;;  %s2429_s22 = smov 0  }
   0x2   :  { %s2431_s23 = smov 0   ;;  %s2433_s24 = smov 0  }
   0x3 LB: > { %s2448_s25 = sadd.s32 4294967295, %s2386_s24   ;;  %s2020_s26 = sadd.s32 4294967294, %s2386_s24   ;;  %s2386_s24 = sphi %s2433_s24, %s2759_s24   ;;  %s2382_s23 = sphi %s2431_s23, %s2758_s23   ;;  %s2378_s22 = sphi %s2429_s22, %s2757_s22   ;;  %s2374_s21 = sphi %s2427_s21, %s2756_s21  }
   0x4   : > { %s2452_s27 = sadd.s32 1, %s2386_s24   ;;  %s157_s28 = sadd.s32 1, %s2382_s23 }
   0x5   : > { %s154_s29 = ssub.s32 %s2386_s24, %s2452_s27  ;;  %p167_p0 = scmp.ne.s32.totalorder %s2382_s23, %s2378_s22 }
   0x6   : > { %p155_p1 = scmp.eq.s32.totalorder %s154_s29, 0  ;;  %p168_p2 = scmp.eq.s32.totalorder %s2448_s25, 1 }
   0x7   : > { %p173_p3 = scmp.ne.s32.totalorder %s2378_s22, %s2374_s21  ;;  %p174_p4 = scmp.eq.s32.totalorder %s2020_s26, 1 }
   0x8   : > { %s2463_s30 = scalar_select %p155_p1, %s2382_s23, %s157_s28  }
   0x9   : > { %p2465_p5 = por %p168_p2, %p167_p0  ;;  %p2469_p6 = por %p174_p4, %p173_p3 }
   0xa   : > { %p2023_p7 = scmp.ge.s32.totalorder %s2386_s24, 1  ;;  %p214_p8 = scmp.lt.s32.totalorder %s2386_s24, 3 }
   0xc   : > { %p215_p9 = pnand %p2023_p7, %p214_p8 }
   0xd   : > { %p243_p10 = scmp.lt.s32.totalorder (!%p215_p9), %s2448_s25, 1  ;;  %vm256_vm0 = vcmask (!%p215_p9), 261120   ;;  %v281_v7 = vld [vmem:[%s2749_s2] sm:$0xff] (!%p215_p9)  ;;  %v282_v8 = vld [vmem:[%s2749_s2 + $0x8] sm:$0xff] (!%p215_p9)  ;;  %v283_v9 = vld [vmem:[%s2749_s2 + $0x10] sm:$0xff] (!%p215_p9)  ;;  %v2388_v10 = vmov (!%p215_p9), 0.0|0.0   ;;  %v778_v48 = vlaneseq (!%p215_p9) }
   0xe   : > { %218 = sbr.rel (%p215_p9) target bundleno = 2603 (0xa2b), region = 44  ;;  %2224 = vmatprep.subr.bf16.mxu0 (!%p215_p9), %v2388_v10  ;;  %v2225_v11 = vpack.c.bf16 (!%p215_p9), %v282_v8, %v281_v7  ;;  %v284_v12 = vld [vmem:[%s2749_s2 + $0x18] sm:$0xff] (!%p215_p9)  ;;  %vm2389_vm1 = vmmov (!%p215_p9), 0   ;;  %v2390_v13 = vmov (!%p215_p9), 0.0   ;;  %v2026_v19 = vld [vmem:[%s2748_s1] ss:$0 sm:$0xff] (!%p215_p9) }
   0xf   : > { %2115 = vmatprep.mubr.msk.f32.mxu0 (!%p215_p9), %vm2389_vm1, %v2390_v13  ;;  %2143 = vmatprep.subr.mxu1 (!%p215_p9), %v2390_v13  ;;  %v2228_v14 = vpack.c.bf16 (!%p215_p9), %v284_v12, %v283_v9  ;;  %v2027_v21 = vld [vmem:[%s2748_s1 + $0x1] ss:$0 sm:$0xff] (!%p215_p9)  ;;  %v2028_v24 = vld [vmem:[%s2748_s1 + $0x2] ss:$0 sm:$0xff] (!%p215_p9)  ;;  %vm784_vm2 = vcmask (!%p215_p9), 64512   ;;  %v779_v49 = vshrl.u32 (!%p215_p9), %v778_v48, 7 }
  0x10   : > { %2145 = vmatprep.mubr.msk.f32.mxu1 (!%p215_p9), %vm2389_vm1, %v2390_v13  ;;  %2226 = vmatpush3.bf16.msra.mxu0 (!%p215_p9), %v2225_v11  ;;  %v781_v50 = vand.u32 (!%p215_p9), 127, %v778_v48  ;;  %s2391_s20 = smov (!%p215_p9), [#allocation2]  }
  0x11   : > { %2227 = vmatprep.subr.bf16.mxu0 (!%p215_p9), %v2388_v10  ;;  %s2328_s26 = sshll.u32 (!%p215_p9), %s2391_s20, 4  ;;  %s2329_s26 = int_to_ptr.vmem [resolvable:$false] %s2328_s26 }
  0x12   : > { %vm782_vm3 = vcmp.gt.s32.totalorder (!%p215_p9), %v781_v50, %v779_v49  ;;  %s2330_s28 = scalar_lea.vmem (!%p215_p9), %s2329_s26, 256 }
  0x13   : > { %v783_v51 = vsel (!%p215_p9), %vm782_vm3, -1e+30, %v2390_v13 }
  0x14   : > { %2229 = vmatpush3.bf16.msra.mxu0 (!%p215_p9), %v2228_v14 }
  0x15   : > { %s244_s9 = scalar_select %p243_p10, %s2448_s25, 1  ;;  %2118 = vmatprep.subr.mxu0 %v2390_v13 }
  0x17   : > { %s2025_s10 = sshll.u32 %s244_s9, 3  ;;  %s240_s9 = sand.u32 1, %s2378_s22  }
  0x18   : > { %s246_s13 = scalar_lea.vmem %s2747_s0, %s2025_s10  ;;  %s2024_s10 = sshll.u32 %s240_s9, 3 }
  0x19   : > { %v2480_v0 = vld [vmem:[%s246_s13] sm:$0xff]  ;;  %s2053_s13 = sshll.u32 %s2448_s25, 7  ;;  %s242_s14 = scalar_lea.vmem [#allocation2], %s2024_s10 }
  0x1a   : > { %v257_v1 = vsel %vm256_vm0, %v2480_v0, 0.0  ;;  %s1961_s15 = sshll.u32 %s242_s14, 4  ;;  %s2704_s18 = scalar_lea.hbm %s2753_s6, %s2053_s13  ;;  %s2706_s15 = int_to_ptr.vmem [resolvable:$true] %s1961_s15 }
  0x1b   : > { %258 = vadd.xlane.f32.xlu0 %v257_v1  ;;  %s1948_s19 = scalar_lea.sflag [#allocation3], %s240_s9  ;;  %s2324_s25 = scalar_lea.vmem %s2706_s15, 128 }
  0x1c   : > { %p2325_p11 = scmp.ne.s32.totalorder %s2706_s15, %s2324_s25  ;;  %p2331_p0 = scmp.lt.s32.totalorder %s2706_s15, %s2329_s26 }
  0x1d   : > { %p2332_p1 = scmp.lt.s32.totalorder %s2330_s28, %s2324_s25 }
  0x1e   : > { %p2326_p12 = pnand %p2325_p11, %p2465_p5 }
  0x1f   : > { %p2333_p2 = por %p2332_p1, %p2331_p0 }
  0x20   : > { %p2327_p13 = pneg %p2326_p12 }
  0x22   : > { %p2334_p3 = pnand %p2333_p2, %p2327_p13 }
  0xa8   : > { %v259_v2 = vpop.xlane.xlu0 %258 }
  0xa9   : > { %v261_v3 = vmul.f32 0.03125, %v259_v2 }
  0xab   : > { %v262_v4 = vsub.f32 %v2480_v0, %v261_v3 }
  0xad   : > { %v263_v5 = vmul.f32 %v262_v4, %v262_v4 }
  0xaf   : > { %v264_v6 = vsel %vm256_vm0, %v263_v5, 0.0 }
  0xb0   : > { %265 = vadd.xlane.f32.xlu0 %v264_v6 }
 0x13d   : > { %v266_v15 = vpop.xlane.xlu0 %265 }
 0x13e   : > { %v267_v16 = vmul.f32 0.03125, %v266_v15 }
 0x140   : > { %v268_v17 = vadd.f32 1e-05, %v267_v16 }
 0x142   : > { %2302 = vrsqrt.f32 %v268_v17 }
 0x14c   : > { %v2303_v18 = vpop.eup %2302 }
 0x14d   : > { %v270_v20 = vmul.f32 %v2303_v18, %v262_v4 }
 0x14f   : > { %v275_v22 = vmul.f32 %v2026_v19, %v270_v20 }
 0x151   : > { %v280_v23 = vadd.f32 %v2027_v21, %v275_v22 }
 0x153   : > { %2116 = vmatmul.mubr.msk.f32.vlgmr.msra.gmra.mrb[0].mxu0 %vm256_vm0, %v280_v23 }
 0x154   : > { %2120 = vmatprep.mubr.msk.f32.mxu0 %vm2389_vm1, %v2390_v13 }
 0x226   : > { %v358_v25 = vpop.f32.mrb[0].mxu0 }
 0x227   : > { %v2117_v26 = vpop.f32.mrb[1].mxu0  ;;  %v359_v27 = vadd.f32 %v2028_v24, %v358_v25 }
 0x229   : > { %362 = vxpose.xlu1.b32.start.end [1/1] (short) (narrow) %v359_v27, 96 }
 0x2a9   : > { %v378_v28 = vpop.trf.xlu1 }
 0x2aa   : > { %394 = vxpose.xlu0.b32.start.end [1/1] (short) (narrow) %v378_v28, 8 }
 0x2ad   : > { %v379_v29 = vpop.trf.xlu1 }
 0x2ae   : > { %426 = vxpose.xlu0.b32.start.end [1/1] (short) (narrow) %v379_v29, 8 }
 0x2b1   : > { %v380_v30 = vpop.trf.xlu1 }
 0x2b2   : > { %458 = vxpose.xlu0.b32.start.end [1/1] (short) (narrow) %v380_v30, 8 }
 0x2b5   : > { %v381_v31 = vpop.trf.xlu1 }
 0x2b6   : > { %490 = vxpose.xlu0.b32.start.end [1/1] (short) (narrow) %v381_v31, 8 }
 0x2b9   : > { %v382_v32 = vpop.trf.xlu1 }
 0x2ba   : > { %522 = vxpose.xlu1.b32.start.end [1/1] (short) (narrow) %v382_v32, 8 }
 0x2bd   : > { %v383_v33 = vpop.trf.xlu1 }
 0x2be   : > { %554 = vxpose.xlu1.b32.start.end [1/1] (short) (narrow) %v383_v33, 8 }
 0x2c1   : > { %v384_v34 = vpop.trf.xlu1 }
 0x2c2   : > { %586 = vxpose.xlu1.b32.start.end [1/1] (short) (narrow) %v384_v34, 8 }
 0x2c5   : > { %v385_v35 = vpop.trf.xlu1 }
 0x2c6   : > { %618 = vxpose.xlu1.b32.start.end [1/1] (short) (narrow) %v385_v35, 8 }
 0x2c9   : > { %v2518_v36 = vpop.trf.xlu1 }
 0x2cd   : > { %v2520_v37 = vpop.trf.xlu1 }
 0x2d1   : > { %v2522_v38 = vpop.trf.xlu1 }
 0x2d5   : > { %v2524_v39 = vpop.trf.xlu1 }
 0x32a   : > { %v410_v40 = vpop.trf.xlu0 }
 0x32e   : > { %v442_v42 = vpop.trf.xlu0 }
 0x332   : > { %v474_v44 = vpop.trf.xlu0 }
 0x336   : > { %v506_v47 = vpop.trf.xlu0 }
 0x33a   : > { %v538_v41 = vpop.trf.xlu1 }
 0x33b   : > { %2119 = vmatpush3.xpose.msk.msra.mxu0 %vm784_vm2, %v538_v41 }
 0x33c   : > { %2123 = vmatprep.subr.mxu0 %v2390_v13 }
 0x33e   : > { %2121 = vmatmul.mubr.msk.f32.vlgmr.msra.gmra.mrb[2].mxu0 %vm784_vm2, %v410_v40  ;;  %v570_v43 = vpop.trf.xlu1 }
 0x33f   : > { %2124 = vmatpush3.xpose.msk.msra.mxu0 %vm784_vm2, %v570_v43  ;;  %2125 = vmatprep.mubr.msk.f32.mxu0 %vm2389_vm1, %v2390_v13 }
 0x340   : > { %2128 = vmatprep.subr.mxu0 %v2390_v13 }
 0x342   : > { %2126 = vmatmul.mubr.msk.f32.vlgmr.msra.gmra.mrb[4].mxu0 %vm784_vm2, %v442_v42  ;;  %v602_v45 = vpop.trf.xlu1 }
 0x343   : > { %2129 = vmatpush3.xpose.msk.msra.mxu0 %vm784_vm2, %v602_v45  ;;  %2130 = vmatprep.mubr.msk.f32.mxu0 %vm2389_vm1, %v2390_v13 }
 0x344   : > { %2133 = vmatprep.subr.mxu0 %v2390_v13 }
 0x346   : > { %2131 = vmatmul.mubr.msk.f32.vlgmr.msra.gmra.mrb[6].mxu0 %vm784_vm2, %v474_v44  ;;  %v634_v46 = vpop.trf.xlu1 }
 0x347   : > { %2134 = vmatpush3.xpose.msk.msra.mxu0 %vm784_vm2, %v634_v46  ;;  %2135 = vmatprep.mubr.msk.f32.mxu0 %vm2389_vm1, %v2390_v13 }
 0x348   : > { %2138 = vmatprep.subr.mxu0 %v2390_v13 }
 0x34a   : > { %2136 = vmatmul.mubr.msk.f32.vlgmr.msra.gmra.mrb[8].mxu0 %vm784_vm2, %v506_v47 }
 0x34b   : > { %2140 = vmatprep.mubr.msk.f32.mxu0 %vm2389_vm1, %v2390_v13 }
 0x411   : > { %v857_v52 = vpop.f32.mrb[2].mxu0 }
 0x412   : > { %v858_v53 = vadd.f32 %v857_v52, %v783_v51  ;;  %v2122_v54 = vpop.f32.mrb[3].mxu0 }
 0x414   : > { %v1089_v55 = vsel %vm784_vm2, %v858_v53, -inf }
 0x415   : > { %1090 = vmax.xlane.f32.xlu1 %v1089_v55  ;;  %v933_v56 = vpop.f32.mrb[4].mxu0  ;;  %v1438_v55 = vld [vmem:[%s2750_s3 + $0x8] sm:$0xff] }
 0x416   : > { %v934_v57 = vadd.f32 %v933_v56, %v783_v51  ;;  %v2127_v58 = vpop.f32.mrb[5].mxu0  ;;  %v1437_v56 = vld [vmem:[%s2750_s3] sm:$0xff] }
 0x418   : > { %v1092_v59 = vsel %vm784_vm2, %v934_v57, -inf }
 0x419   : > { %1093 = vmax.xlane.f32.xlu0 %v1092_v59  ;;  %v1009_v60 = vpop.f32.mrb[6].mxu0 }
 0x41a   : > { %v1010_v61 = vadd.f32 %v1009_v60, %v783_v51  ;;  %v2132_v62 = vpop.f32.mrb[7].mxu0  ;;  %v1439_v60 = vld [vmem:[%s2750_s3 + $0x10] sm:$0xff] }
 0x41c   : > { %v1095_v63 = vsel %vm784_vm2, %v1010_v61, -inf }
 0x41d   : > { %1096 = vmax.xlane.f32.xlu1 %v1095_v63  ;;  %v1085_v1 = vpop.f32.mrb[8].mxu0 }
 0x41e   : > { %v1086_v2 = vadd.f32 %v1085_v1, %v783_v51  ;;  %v2137_v3 = vpop.f32.mrb[9].mxu0 }
 0x420   : > { %v1098_v4 = vsel %vm784_vm2, %v1086_v2, -inf }
 0x421   : > { %1099 = vmax.xlane.f32.xlu1 %v1098_v4 }
 0x4a2   : > { %v1091_v5 = vpop.xlane.xlu1 %1090 }
 0x4a3   : > { %v1101_v6 = vsub.f32 %v858_v53, %v1091_v5 }
 0x4a5   : > { %v1105_v7 = vmul.f32 1.442695, %v1101_v6 }
 0x4a6   : > { %v1094_v8 = vpop.xlane.xlu0 %1093 }
 0x4a7   : > { %2304 = vpow2.f32 %v1105_v7  ;;  %v1102_v9 = vsub.f32 %v934_v57, %v1094_v8  ;;  %v1440_v57 = vld [vmem:[%s2750_s3 + $0x18] sm:$0xff] }
 0x4a9   : > { %v1107_v11 = vmul.f32 1.442695, %v1102_v9 }
 0x4aa   : > { %v1097_v12 = vpop.xlane.xlu1 %1096 }
 0x4ab   : > { %2306 = vpow2.f32 %v1107_v11  ;;  %v1103_v14 = vsub.f32 %v1010_v61, %v1097_v12 }
 0x4ad   : > { %v1109_v15 = vmul.f32 1.442695, %v1103_v14 }
 0x4ae   : > { %v1100_v16 = vpop.xlane.xlu1 %1099 }
 0x4af   : > { %2308 = vpow2.f32 %v1109_v15  ;;  %v1104_v17 = vsub.f32 %v1086_v2, %v1100_v16 }
 0x4b1   : > { %v2305_v18 = vpop.eup %2304  ;;  %v1111_v19 = vmul.f32 1.442695, %v1104_v17 }
 0x4b2   : > { %v1113_v20 = vsel %vm784_vm2, %v2305_v18, 0.0 }
 0x4b3   : > { %2310 = vpow2.f32 %v1111_v19  ;;  %1114 = vadd.xlane.f32.xlu1 %v1113_v20 }
 0x4b5   : > { %v2307_v21 = vpop.eup %2306 }
 0x4b6   : > { %v1116_v22 = vsel %vm784_vm2, %v2307_v21, 0.0 }
 0x4b7   : > { %1117 = vadd.xlane.f32.xlu0 %v1116_v22 }
 0x4b9   : > { %v2309_v23 = vpop.eup %2308 }
 0x4ba   : > { %v1119_v24 = vsel %vm784_vm2, %v2309_v23, 0.0 }
 0x4bb   : > { %1120 = vadd.xlane.f32.xlu1 %v1119_v24 }
 0x4bd   : > { %v2311_v25 = vpop.eup %2310 }
 0x4be   : > { %v1122_v26 = vsel %vm784_vm2, %v2311_v25, 0.0 }
 0x4bf   : > { %1123 = vadd.xlane.f32.xlu0 %v1122_v26 }
 0x4ec   : > { %682 = vxpose.xlu0.b32.start.end [1/1] (short) (narrow) %v2520_v37, 8 }
 0x4ee   : > { %650 = vxpose.xlu1.b32.start.end [1/1] (short) (narrow) %v2518_v36, 8 }
 0x4f0   : > { %714 = vxpose.xlu0.b32.start.end [1/1] (short) (narrow) %v2522_v38, 8 }
 0x4f4   : > { %746 = vxpose.xlu0.b32.start.end [1/1] (short) (narrow) %v2524_v39, 8 }
 0x540   : > { %v1115_v28 = vpop.xlane.xlu1 %1114 }
 0x544   : > { %v1118_v27 = vpop.xlane.xlu0 %1117 }
 0x545   : > { %2312 = vrcp.f32 %v1118_v27 }
 0x546   : > { %2314 = vrcp.f32 %v1115_v28 }
 0x548   : > { %v1121_v29 = vpop.xlane.xlu1 %1120 }
 0x549   : > { %2316 = vrcp.f32 %v1121_v29 }
 0x54c   : > { %v1124_v30 = vpop.xlane.xlu0 %1123 }
 0x54d   : > { %2318 = vrcp.f32 %v1124_v30 }
 0x54f   : > { %v2313_v31 = vpop.eup %2312 }
 0x550   : > { %v2315_v32 = vpop.eup %2314  ;;  %v1130_v33 = vmul.f32 %v2313_v31, %v1118_v27 }
 0x551   : > { %v1129_v34 = vmul.f32 %v2315_v32, %v1115_v28 }
 0x552   : > { %v1134_v37 = vsub.f32 2.0, %v1130_v33 }
 0x553   : > { %v2317_v35 = vpop.eup %2316  ;;  %v1133_v36 = vsub.f32 2.0, %v1129_v34  ;;  %v1855_v34 = vld [vmem:[%s2752_s5] sm:$0xff] }
 0x554   : > { %v1131_v41 = vmul.f32 %v2317_v35, %v1121_v29  ;;  %v1138_v38 = vmul.f32 %v2313_v31, %v1134_v37  ;;  %v1769_v29 = vld [vmem:[%s2751_s4] sm:$0xff]  ;;  %v1771_v31 = vld [vmem:[%s2751_s4 + $0x10] sm:$0xff] }
 0x555   : > { %v1137_v39 = vmul.f32 %v2315_v32, %v1133_v36  ;;  %v1772_v32 = vld [vmem:[%s2751_s4 + $0x18] sm:$0xff]  ;;  %v1857_v37 = vld [vmem:[%s2752_s5 + $0x10] sm:$0xff] }
 0x556   : > { %v1135_v43 = vsub.f32 2.0, %v1131_v41  ;;  %v1142_v44 = vmul.f32 %v2307_v21, %v1138_v38  ;;  %v2234_v33 = vpack.c.bf16 %v1772_v32, %v1771_v31  ;;  %v1858_v36 = vld [vmem:[%s2752_s5 + $0x18] sm:$0xff]  ;;  %v1859_v38 = vld [vmem:[%s2752_s5 + $0x20] sm:$0xff] }
 0x557   : > { %v2319_v40 = vpop.eup %2318  ;;  %v1141_v47 = vmul.f32 %v2305_v18, %v1137_v39  ;;  %v2046_v18 = vld [vmem:[%s2748_s1 + $0x3] ss:$0 sm:$0xff]  ;;  %v2240_v41 = vpack.c.bf16 %v1858_v36, %v1857_v37 }
 0x558   : > { %v1132_v42 = vmul.f32 %v2319_v40, %v1124_v30  ;;  %v1139_v48 = vmul.f32 %v2317_v35, %v1135_v43  ;;  %v1856_v35 = vld [vmem:[%s2752_s5 + $0x8] sm:$0xff] }
 0x55a   : > { %v1136_v45 = vsub.f32 2.0, %v1132_v42  ;;  %v1143_v52 = vmul.f32 %v2309_v23, %v1139_v48  ;;  %v1860_v42 = vld [vmem:[%s2752_s5 + $0x28] sm:$0xff] }
 0x55b   : > { %v2243_v39 = vpack.c.bf16 %v1860_v42, %v1859_v38 }
 0x55c   : > { %v1140_v50 = vmul.f32 %v2319_v40, %v1136_v45  ;;  %v2237_v40 = vpack.c.bf16 %v1856_v35, %v1855_v34 }
 0x55e   : > { %v1144_v53 = vmul.f32 %v2311_v25, %v1140_v50 }
 0x56c   : > { %v698_v46 = vpop.trf.xlu0 }
 0x56d   : > { %2144 = vmatpush3.msra.mxu1 %v698_v46 }
 0x56e   : > { %2146 = vmatmul.mubr.msk.f32.vlgmr.msra.gmra.mrb[0].mxu1 %vm784_vm2, %v1142_v44  ;;  %v666_v49 = vpop.trf.xlu1  ;;  %2153 = vmatprep.subr.mxu1 %v2390_v13 }
 0x56f   : > { %2139 = vmatpush3.msra.mxu0 %v666_v49  ;;  %2155 = vmatprep.mubr.msk.f32.mxu1 %vm2389_vm1, %v2390_v13  ;;  %v2048_v49 = vld [vmem:[%s2748_s1 + $0x5] ss:$0 sm:$0xff] }
 0x570   : > { %v730_v51 = vpop.trf.xlu0  ;;  %2141 = vmatmul.mubr.msk.f32.vlgmr.msra.gmra.mrb[10].mxu0 %vm784_vm2, %v1141_v47  ;;  %2148 = vmatprep.subr.mxu0 %v2390_v13  ;;  %v2047_v47 = vld [vmem:[%s2748_s1 + $0x4] ss:$0 sm:$0xff] }
 0x571   : > { %2149 = vmatpush3.msra.mxu0 %v730_v51  ;;  %2150 = vmatprep.mubr.msk.f32.mxu0 %vm2389_vm1, %v2390_v13 }
 0x572   : > { %2158 = vmatprep.subr.mxu0 %v2390_v13 }
 0x574   : > { %v762_v54 = vpop.trf.xlu0  ;;  %2151 = vmatmul.mubr.msk.f32.vlgmr.msra.gmra.mrb[12].mxu0 %vm784_vm2, %v1143_v52  ;;  %v1861_v52 = vld [vmem:[%s2752_s5 + $0x30] sm:$0xff] }
 0x575   : > { %2154 = vmatpush3.msra.mxu1 %v762_v54  ;;  %2160 = vmatprep.mubr.msk.f32.mxu0 %vm2389_vm1, %v2390_v13 }
 0x576   : > { %2156 = vmatmul.mubr.msk.f32.vlgmr.msra.gmra.mrb[2].mxu1 %vm784_vm2, %v1144_v53  ;;  %2163 = vmatprep.subr.mxu1 %v2390_v13  ;;  %v1862_v53 = vld [vmem:[%s2752_s5 + $0x38] sm:$0xff] }
 0x577   : > { %2165 = vmatprep.mubr.msk.f32.mxu1 %vm2389_vm1, %v2390_v13  ;;  %2164 = vmatpush3.msra.mxu1 %v1438_v55  ;;  %v2246_v54 = vpack.c.bf16 %v1862_v53, %v1861_v52  ;;  %v1863_v55 = vld [vmem:[%s2752_s5 + $0x40] sm:$0xff] }
 0x578   : > { %2173 = vmatprep.subr.mxu1 %v2390_v13  ;;  %2159 = vmatpush3.msra.mxu0 %v1437_v56  ;;  %v1864_v56 = vld [vmem:[%s2752_s5 + $0x48] sm:$0xff] }
 0x579   : > { %2168 = vmatprep.subr.mxu0 %v2390_v13 }
 0x641   : > { %v1287_v58 = vpop.f32.mrb[0].mxu1 }
 0x642   : > { %v2147_v59 = vpop.f32.mrb[1].mxu1  ;;  %2166 = vmatmul.mubr.msk.f32.vlgmr.msra.gmra.mrb[4].mxu1 %vm784_vm2, %v1287_v58  ;;  %v1865_v58 = vld [vmem:[%s2752_s5 + $0x50] sm:$0xff] }
 0x643   : > { %v1214_v61 = vpop.f32.mrb[10].mxu0  ;;  %2174 = vmatpush3.msra.mxu1 %v1440_v57  ;;  %2175 = vmatprep.mubr.msk.f32.mxu1 %vm2389_vm1, %v2390_v13  ;;  %v2249_v57 = vpack.c.bf16 %v1864_v56, %v1863_v55  ;;  %v1866_v59 = vld [vmem:[%s2752_s5 + $0x58] sm:$0xff] }
 0x644   : > { %v2142_v62 = vpop.f32.mrb[11].mxu0  ;;  %2161 = vmatmul.mubr.msk.f32.vlgmr.msra.gmra.mrb[14].mxu0 %vm784_vm2, %v1214_v61  ;;  %2236 = vmatprep.subr.bf16.mxu1 %v2388_v10  ;;  %v1867_v61 = vld [vmem:[%s2752_s5 + $0x60] sm:$0xff] }
 0x645   : > { %2169 = vmatpush3.msra.mxu0 %v1439_v60  ;;  %2170 = vmatprep.mubr.msk.f32.mxu0 %vm2389_vm1, %v2390_v13  ;;  %v2252_v60 = vpack.c.bf16 %v1866_v59, %v1865_v58  ;;  %v1868_v62 = vld [vmem:[%s2752_s5 + $0x68] sm:$0xff] }
 0x646   : > { %2230 = vmatprep.subr.bf16.mxu0 %v2388_v10 }
 0x647   : > { %v1360_v63 = vpop.f32.mrb[12].mxu0 }
 0x648   : > { %v2152_v1 = vpop.f32.mrb[13].mxu0  ;;  %2171 = vmatmul.mubr.msk.f32.vlgmr.msra.gmra.mrb[16].mxu0 %vm784_vm2, %v1360_v63  ;;  %v2255_v63 = vpack.c.bf16 %v1868_v62, %v1867_v61 }
 0x649   : > { %v1433_v2 = vpop.f32.mrb[2].mxu1  ;;  %2186 = vmatprep.mubr.msk.f32.mxu0 %vm2389_vm1, %v2390_v13  ;;  %v1869_v1 = vld [vmem:[%s2752_s5 + $0x70] sm:$0xff] }
 0x64a   : > { %v2157_v3 = vpop.f32.mrb[3].mxu1  ;;  %2176 = vmatmul.mubr.msk.f32.vlgmr.msra.gmra.mrb[6].mxu1 %vm784_vm2, %v1433_v2  ;;  %v1870_v2 = vld [vmem:[%s2752_s5 + $0x78] sm:$0xff] }
 0x64b   : > { %2221 = vmatprep.mubr.msk.f32.mxu1 %vm2389_vm1, %v2390_v13  ;;  %2238 = vmatpush3.bf16.msra.mxu1 %v2237_v40  ;;  %v2258_v3 = vpack.c.bf16 %v1870_v2, %v1869_v1 }
 0x64c   : > { %2239 = vmatprep.subr.bf16.mxu1 %v2388_v10 }
 0x64f   : > { %2241 = vmatpush3.bf16.msra.mxu1 %v2240_v41 }
 0x650   : > { %2242 = vmatprep.subr.bf16.mxu1 %v2388_v10 }
 0x653   : > { %2244 = vmatpush3.bf16.msra.mxu1 %v2243_v39 }
 0x654   : > { %2245 = vmatprep.subr.bf16.mxu1 %v2388_v10 }
 0x657   : > { %2247 = vmatpush3.bf16.msra.mxu1 %v2246_v54 }
 0x658   : > { %2248 = vmatprep.subr.bf16.mxu1 %v2388_v10 }
 0x65b   : > { %2250 = vmatpush3.bf16.msra.mxu1 %v2249_v57 }
 0x65c   : > { %2251 = vmatprep.subr.bf16.mxu1 %v2388_v10 }
 0x65f   : > { %2253 = vmatpush3.bf16.msra.mxu1 %v2252_v60 }
 0x660   : > { %2254 = vmatprep.subr.bf16.mxu1 %v2388_v10 }
 0x663   : > { %2256 = vmatpush3.bf16.msra.mxu1 %v2255_v63 }
 0x664   : > { %2257 = vmatprep.subr.bf16.mxu1 %v2388_v10 }
 0x667   : > { %2259 = vmatpush3.bf16.msra.mxu1 %v2258_v3 }
 0x715   : > { %v1583_v4 = vpop.f32.mrb[4].mxu1 }
 0x716   : > { %v2167_v5 = vpop.f32.mrb[5].mxu1  ;;  %v1734_v7 = vsel %vm256_vm0, %v1583_v4, 0.0  ;;  %v2049_v4 = vld [vmem:[%s2748_s1 + $0x6] ss:$0 sm:$0xff] }
 0x717   : > { %v1510_v6 = vpop.f32.mrb[14].mxu0 }
 0x718   : > { %v1733_v8 = vsel %vm256_vm0, %v1510_v6, 0.0  ;;  %v2162_v9 = vpop.f32.mrb[15].mxu0 }
 0x719   : > { %v1735_v11 = vadd.f32 %v1734_v7, %v1733_v8 }
 0x71b   : > { %v1656_v12 = vpop.f32.mrb[16].mxu0 }
 0x71c   : > { %v1736_v14 = vsel %vm256_vm0, %v1656_v12, 0.0  ;;  %v2172_v15 = vpop.f32.mrb[17].mxu0 }
 0x71d   : > { %v1737_v16 = vadd.f32 %v1736_v14, %v1735_v11  ;;  %v1729_v17 = vpop.f32.mrb[6].mxu1  ;;  %v2051_v14 = vld [vmem:[%s2748_s1 + $0x7] ss:$0 sm:$0xff] }
 0x71e   : > { %v1738_v13 = vsel %vm256_vm0, %v1729_v17, 0.0  ;;  %v2177_v19 = vpop.f32.mrb[7].mxu1 }
 0x71f   : > { %v1739_v20 = vadd.f32 %v1738_v13, %v1737_v16 }
 0x721   : > { %v1744_v21 = vadd.f32 %v2046_v18, %v1739_v20 }
 0x723   : > { %v2611_v22 = vadd.f32 %v1744_v21, %v2480_v0  ;;  %v1770_v0 = vld [vmem:[%s2751_s4 + $0x8] sm:$0xff] }
 0x724   : > { %v2231_v30 = vpack.c.bf16 %v1770_v0, %v1769_v29 }
 0x725   : > { %v1746_v23 = vsel %vm256_vm0, %v2611_v22, 0.0 }
 0x726   : > { %1747 = vadd.xlane.f32.xlu1 %v1746_v23  ;;  %2232 = vmatpush3.bf16.msra.mxu0 %v2231_v30 }
 0x727   : > { %2233 = vmatprep.subr.bf16.mxu0 %v2388_v10 }
 0x72a   : > { %2235 = vmatpush3.bf16.msra.mxu0 %v2234_v33 }
 0x7b3   : > { %v1748_v24 = vpop.xlane.xlu1 %1747 }
 0x7b4   : > { %v1749_v25 = vmul.f32 0.03125, %v1748_v24 }
 0x7b6   : > { %v1750_v26 = vsub.f32 %v2611_v22, %v1749_v25 }
 0x7b8   : > { %v1751_v27 = vmul.f32 %v1750_v26, %v1750_v26 }
 0x7ba   : > { %v1752_v28 = vsel %vm256_vm0, %v1751_v27, 0.0 }
 0x7bb   : > { %1753 = vadd.xlane.f32.xlu0 %v1752_v28 }
 0x848   : > { %v1754_v43 = vpop.xlane.xlu0 %1753 }
 0x849   : > { %v1755_v44 = vmul.f32 0.03125, %v1754_v43 }
 0x84b   : > { %v1756_v45 = vadd.f32 1e-05, %v1755_v44 }
 0x84d   : > { %2320 = vrsqrt.f32 %v1756_v45 }
 0x857   : > { %v2321_v46 = vpop.eup %2320 }
 0x858   : > { %v1758_v48 = vmul.f32 %v2321_v46, %v1750_v26 }
 0x85a   : > { %v1763_v50 = vmul.f32 %v2047_v47, %v1758_v48 }
 0x85c   : > { %v1768_v51 = vadd.f32 %v2048_v49, %v1763_v50 }
 0x85e   : > { %2187 = vmatmul.mubr.msk.f32.vlgmr.msra.gmra.mrb[18].mxu0 %vm256_vm0, %v1768_v51 }
 0x931   : > { %v1846_v5 = vpop.f32.mrb[18].mxu0 }
 0x932   : > { %v1847_v6 = vadd.f32 %v2049_v4, %v1846_v5  ;;  %v2188_v7 = vpop.f32.mrb[19].mxu0 }
 0x934   : > { %v1851_v10 = vmul.f32 0.70710677, %v1847_v6  ;;  %v1850_v9 = vmul.f32 0.5, %v1847_v6 }
 0x936   : > { %2322 = verf.f32 %v1851_v10 }
 0x940   : > { %v2323_v8 = vpop.eup %2322 }
 0x941   : > { %v1853_v11 = vadd.f32 1.0, %v2323_v8 }
 0x943   : > { %v1854_v12 = vmul.f32 %v1853_v11, %v1850_v9 }
 0x945   : > { %2222 = vmatmul.mubr.f32.vlgmr.msra.gmra.mrb[8].mxu1 %v1854_v12 }
 0xa18   : > { %v1941_v15 = vpop.f32.mrb[8].mxu1 }
 0xa19   : > { %v1942_v16 = vadd.f32 %v2051_v14, %v1941_v15  ;;  %v2223_v17 = vpop.f32.mrb[9].mxu1 }
 0xa1b   : > { %v1945_v18 = vadd.f32 %v1942_v16, %v2611_v22 }
 0xa1d   : > { %1946 = vst.msk [vmem:[%s242_s14] sm:$0xff] %vm256_vm0, %v1945_v18 }
 0xa1e   : > { %2337 = shalt.err (!%p2334_p3)
}
 0xa1f   : > { %s2338_s29 = scalar_lea.hbm %s2704_s18, 128  ;;  %s2342_s11 = scalar_lea.hbm %s2753_s6, 256 }
 0xa20   : > { %p2339_p4 = scmp.ne.s32.totalorder %s2704_s18, %s2338_s29  ;;  %p2343_p9 = scmp.lt.u32.totalorder %s2704_s18, %s2753_s6 }
 0xa21   : > { %p2344_p10 = scmp.lt.u32.totalorder %s2342_s11, %s2338_s29  ;;  %p2346_p12 = scmp.lt.u32.totalorder %s2338_s29, %s2704_s18 }
 0xa22   : > { %p2340_p7 = pnand %p2339_p4, %p2465_p5 }
 0xa23   : > { %p2345_p11 = por %p2344_p10, %p2343_p9 }
 0xa24   : > { %p2341_p8 = pneg %p2340_p7 }
 0xa25   : > { %p2347_p13 = por %p2346_p12, %p2345_p11 }
 0xa27   : > { %p2348_p0 = pnand %p2347_p13, %p2341_p8 }
 0xa29   : > { %2351 = shalt.err (!%p2348_p0)
}
 0xa2a   : > { %2260 = dma.vmem_to_hbm [thread:$0]  (%p2465_p5), %s2706_s15, 128, %s2704_s18, %s1948_s19  }
 0xa2b PF: > { %p2266_p1 = scmp.ge.s32.totalorder %s2386_s24, 2  ;;  %s1973_s14 = sand.u32 1, %s2374_s21  }
 0xa2c   : > { %s1974_s16 = scalar_lea.sflag [#allocation3], %s1973_s14 }
 0xa2d   : > { %p2263_p2 = pnand %p2266_p1, %p2469_p6 }
 0xa2f   : > { %2369 = dma.done.wait (!%p2263_p2), %s1974_s16, 128  }
 0xa30   : > { %2371 = vsyncadd (!%p2263_p2), %s1974_s16, 4294967168  ;;  %p16_p3 = scmp.ge.s32.totalorder %s2452_s27, 4   ;;  %s2756_s21 = smov %s2378_s22 }
 0xa31   : > { %s2757_s22 = smov %s2382_s23  ;;  %s2758_s23 = smov %s2463_s30 }
 0xa32   : > { %s2759_s24 = smov %s2452_s27  ;;  %18 = sbr.rel (!%p16_p3) target bundleno = 3 (0x3), region = 79 }
 0xa39   :  { %1979 = vsyncpa [#allocation3], 1 }
 0xa3a   :  { %1981 = vsyncpa [#allocation3 + $0x1], 1 }

</bundles_post_ra>
